<compile_context>
chip_gen: v7x
topology: tpu7x:2x2x1
jax: 0.10.0
libtpu: 0.0.40
codegen_flags: <defaults>
</compile_context>

<pallas_src>
import jax
import jax.numpy as jnp
from jax import lax
from jax.experimental import pallas as pl
from jax.experimental.pallas import tpu as pltpu


def _make_context_kernel(nb, cin, width, S, tap_offsets):
    """Kernel body; static shape params are closed over."""
    def kernel(x_ref, w_ref, b_ref, cat_ref, f0_ref, f1_ref, xcol_scr):
        # x_ref:    (nb, cin, L)          flattened, spatially padded input
        # w_ref:    (2*width, 9*cin)      fused conv0+conv1 weights, BN-scaled
        # b_ref:    (2*width, 1)          folded BN bias (f32)
        # cat_ref:  (nb, 2*width, S)      S = H * Wp (padded-width rows)
        # f0_ref:   (nb, width, S)
        # f1_ref:   (nb, width, S)
        # xcol_scr: (9*cin, S)            im2col scratch, fully rewritten per image
        w = w_ref[...]                    # hoisted: read weights/bias once per step
        bias = b_ref[...]
        for bb in range(nb):              # static unroll over the batch block
            # im2col: each dilated tap is a constant-offset lane slice of the
            # flattened padded image; stack the 9 taps along the contraction axis.
            for t, off in enumerate(tap_offsets):
                xcol_scr[t * cin:(t + 1) * cin, :] = x_ref[bb, :, off:off + S]
            # one fused MXU matmul: [feat0 | feat1] = W @ im2col  (lane-dense out)
            f = jnp.dot(w, xcol_scr[...], preferred_element_type=jnp.float32)
            f = jnp.maximum(f + bias, 0.0)        # folded-BN bias + ReLU (f32)
            f = f.astype(cat_ref.dtype)
            cat_ref[bb] = f                       # concatenated output for free
            f0_ref[bb] = f[:width]
            f1_ref[bb] = f[width:]
    return kernel


def _pick_batch_block(n):
    # Prefer >=2 grid steps (feeds both v7x TensorCores through the "parallel"
    # batch axis) while batching enough per step to amortize grid overhead.
    target = max(1, min(8, n // 2))
    for nb in range(target, 0, -1):
        if n % nb == 0:
            return nb
    return 1


def context_forward(x_nchw, w0_oihw, w1_oihw, bn0, bn1, dilation,
                    *, batch_block=None, compute_dtype=jnp.float32, eps=1e-5):
    """
    x_nchw:  (N, Cin, H, W) float32    (PyTorch layout)
    w0_oihw: (width, Cin, 1, 1)        conv0 weight
    w1_oihw: (width, Cin, 3, 3)        conv1 weight
    bn0/bn1: dicts with gamma, beta, mean, var  (per-channel, shape (width,))
    compute_dtype: jnp.float32 or jnp.bfloat16 (bf16 halves HBM/VMEM traffic on
                   the memory-bound path; accumulation/epilogue stay f32).
    Returns (cat, feat0, feat1) in NCHW, matching the PyTorch module.
    """
    N, Cin, H, W = x_nchw.shape
    width = int(w0_oihw.shape[0])
    d = int(dilation)
    Hp, Wp = H + 2 * d, W + 2 * d
    S = H * Wp                                     # per-tap slab: all output rows, padded width
    # flattened padded length: last tap reads up to Hp*Wp + 2*d; round to 128 lanes
    L = -(-(Hp * Wp + 2 * d) // 128) * 128

    nb = batch_block if batch_block is not None else _pick_batch_block(N)
    assert N % nb == 0, "batch_block must divide N"

    # ---- input prep (input-side only): zero-pad spatially, flatten rows so each
    #      dilated tap is a constant lane offset inside the kernel.
    x_pad = jnp.pad(x_nchw, ((0, 0), (0, 0), (d, d), (d, d)))
    x_flat = jnp.pad(x_pad.reshape(N, Cin, Hp * Wp),
                     ((0, 0), (0, 0), (0, L - Hp * Wp))).astype(compute_dtype)

    # ---- fuse conv0 + conv1 + BN scale into one (2*width, 9*Cin) weight ----
    def fold(bn):
        scale = bn["gamma"] / jnp.sqrt(bn["var"] + eps)
        return scale, bn["beta"] - bn["mean"] * scale

    s0, b0 = fold(bn0)
    s1, b1 = fold(bn1)
    # column order: tap*Cin + c, tap = ky*3 + kx  (matches the kernel's im2col order)
    w1_taps = jnp.transpose(w1_oihw, (0, 2, 3, 1)).reshape(width, 9 * Cin)
    center = 4  # (ky, kx) = (1, 1)
    w0_taps = jnp.zeros((width, 9 * Cin), w0_oihw.dtype)
    w0_taps = w0_taps.at[:, center * Cin:(center + 1) * Cin].set(w0_oihw[:, :, 0, 0])
    w_fused = jnp.concatenate([w0_taps * s0[:, None], w1_taps * s1[:, None]],
                              axis=0).astype(compute_dtype)          # (2*width, 9*Cin)
    bias = jnp.concatenate([b0, b1]).reshape(2 * width, 1).astype(jnp.float32)

    tap_offsets = tuple(ky * d * Wp + kx * d for ky in range(3) for kx in range(3))
    kernel = _make_context_kernel(nb, Cin, width, S, tap_offsets)

    C2 = 2 * width
    itemsize = jnp.dtype(compute_dtype).itemsize
    cost = pl.CostEstimate(
        flops=2 * N * C2 * 9 * Cin * S,
        transcendentals=0,
        bytes_accessed=(N * Cin * L * itemsize            # x
                        + C2 * 9 * Cin * itemsize         # fused weights
                        + C2 * 4                          # bias
                        + N * 2 * C2 * S * 4))            # cat + feat0 + feat1 (f32)

    # NOTE: for large H*W / Cin, switch the input block to row-strips with a
    # d-row halo and reduce batch_block (v7x has half the VMEM of v5e/v6e);
    # unnecessary at these sizes (per-step VMEM footprint is < 100 KiB).
    cat_f, f0_f, f1_f = pl.pallas_call(
        kernel,
        out_shape=(jax.ShapeDtypeStruct((N, C2, S), jnp.float32),
                   jax.ShapeDtypeStruct((N, width, S), jnp.float32),
                   jax.ShapeDtypeStruct((N, width, S), jnp.float32)),
        grid_spec=pltpu.PrefetchScalarGridSpec(
            num_scalar_prefetch=0,
            grid=(N // nb,),
            in_specs=[
                pl.BlockSpec((nb, Cin, L), lambda n: (n, 0, 0)),
                pl.BlockSpec((C2, 9 * Cin), lambda n: (0, 0)),
                pl.BlockSpec((C2, 1), lambda n: (0, 0)),
            ],
            out_specs=[
                pl.BlockSpec((nb, C2, S), lambda n: (n, 0, 0)),
                pl.BlockSpec((nb, width, S), lambda n: (n, 0, 0)),
                pl.BlockSpec((nb, width, S), lambda n: (n, 0, 0)),
            ],
            scratch_shapes=[pltpu.VMEM((9 * Cin, S), compute_dtype)],
        ),
        compiler_params=pltpu.CompilerParams(
            dimension_semantics=("parallel",)),
        cost_estimate=cost,
    )(x_flat, w_fused, bias)

    # drop the 2*d padded columns per row -> exact PyTorch NCHW outputs
    def crop(y):
        return y.reshape(N, -1, H, Wp)[:, :, :, :W]

    return crop(cat_f), crop(f0_f), crop(f1_f)


def _reference_forward(x_nchw, w0_oihw, w1_oihw, bn0, bn1, dilation):
    """Pure-JAX reference (lax conv) for correctness checking."""
    eps = 1e-5

    def bn_relu(y, bn):  # y: NCHW
        scale = (bn["gamma"] / jnp.sqrt(bn["var"] + eps)).reshape(1, -1, 1, 1)
        bias = (bn["beta"] - bn["mean"] * bn["gamma"] / jnp.sqrt(bn["var"] + eps)
                ).reshape(1, -1, 1, 1)
        return jnp.maximum(y * scale + bias, 0.0)

    dn = lax.conv_dimension_numbers(x_nchw.shape, w0_oihw.shape,
                                    ("NCHW", "OIHW", "NCHW"))
    y0 = lax.conv_general_dilated(x_nchw, w0_oihw, (1, 1), "VALID",
                                  dimension_numbers=dn)
    y1 = lax.conv_general_dilated(x_nchw, w1_oihw, (1, 1),
                                  [(dilation, dilation), (dilation, dilation)],
                                  rhs_dilation=(dilation, dilation),
                                  dimension_numbers=dn)
    f0 = bn_relu(y0, bn0)
    f1 = bn_relu(y1, bn1)
    return jnp.concatenate([f0, f1], axis=1), f0, f1


if __name__ == "__main__":
    # small shapes consistent with the module
    N, Cin, H, W = 2, 4, 16, 16
    width = 8
    dilation_base = 2

    key = jax.random.PRNGKey(0)
    k = jax.random.split(key, 8)
    x = jax.random.normal(k[0], (N, Cin, H, W), jnp.float32)
    w0 = jax.random.normal(k[1], (width, Cin, 1, 1), jnp.float32) * 0.2
    w1 = jax.random.normal(k[2], (width, Cin, 3, 3), jnp.float32) * 0.1
    bn0 = {"gamma": jax.random.uniform(k[3], (width,), minval=0.5, maxval=1.5),
           "beta": jax.random.normal(k[4], (width,)) * 0.1,
           "mean": jax.random.normal(k[5], (width,)) * 0.1,
           "var": jax.random.uniform(k[6], (width,), minval=0.5, maxval=1.5)}
    bn1 = {"gamma": jnp.ones((width,), jnp.float32),
           "beta": jax.random.normal(k[7], (width,)) * 0.1,
           "mean": jnp.zeros((width,), jnp.float32),
           "var": jnp.ones((width,), jnp.float32)}

    cat_r, f0_r, f1_r = _reference_forward(x, w0, w1, bn0, bn1, dilation_base)

    # default: f32, one batch element per grid step (>=2 grid steps -> both v7x TCs)
    cat, feat0, feat1 = context_forward(x, w0, w1, bn0, bn1, dilation_base)
    jax.block_until_ready((cat, feat0, feat1))
    assert cat.shape == (N, 2 * width, H, W)
    assert feat0.shape == (N, width, H, W) and feat1.shape == (N, width, H, W)
    assert jnp.allclose(feat0, f0_r, atol=5e-4, rtol=5e-4)
    assert jnp.allclose(feat1, f1_r, atol=5e-4, rtol=5e-4)
    assert jnp.allclose(cat, cat_r, atol=5e-4, rtol=5e-4)

    # multi-batch-per-block path (amortizes per-grid-step overhead)
    cat2, f02, f12 = context_forward(x, w0, w1, bn0, bn1, dilation_base,
                                     batch_block=2)
    jax.block_until_ready(cat2)
    assert jnp.allclose(cat2, cat_r, atol=5e-4, rtol=5e-4)
    assert jnp.allclose(f02, f0_r, atol=5e-4, rtol=5e-4)
    assert jnp.allclose(f12, f1_r, atol=5e-4, rtol=5e-4)

    # bf16 input/weight storage (memory-bound win on v5e/v6e), f32 accumulate/epilogue
    cat3, f03, f13 = context_forward(x, w0, w1, bn0, bn1, dilation_base,
                                     compute_dtype=jnp.bfloat16)
    jax.block_until_ready(cat3)
    assert jnp.allclose(cat3, cat_r, atol=1e-1, rtol=1e-1)

    print("KERNEL_OK")
</pallas_src>

<mosaic_0001>
module attributes {stable_mosaic.version = 11 : i64} {
  func.func @kernel(%arg0: i32, %arg1: memref<1x4x512xf32, #tpu.memory_space<vmem>>, %arg2: memref<16x36xf32, #tpu.memory_space<vmem>>, %arg3: memref<16x1xf32, #tpu.memory_space<vmem>>, %arg4: memref<1x16x320xf32, #tpu.memory_space<vmem>>, %arg5: memref<1x8x320xf32, #tpu.memory_space<vmem>>, %arg6: memref<1x8x320xf32, #tpu.memory_space<vmem>>, %arg7: memref<36x320xf32, #tpu.memory_space<vmem>>) attributes {dimension_semantics = [#tpu.dimension_semantics<parallel>], iteration_bounds = array<i64: 2>, scalar_prefetch = 0 : i64, scratch_operands = 1 : i64, tpu.core_type = #tpu.core_type<tc>, window_params = [{transform_indices = @transform_0, window_bounds = array<i64: 1, 4, 512>}, {pipeline_mode = #tpu.pipeline_mode<synchronous>, transform_indices = @transform_1, window_bounds = array<i64: 16, 36>}, {pipeline_mode = #tpu.pipeline_mode<synchronous>, transform_indices = @transform_2, window_bounds = array<i64: 16, 1>}, {transform_indices = @transform_3, window_bounds = array<i64: 1, 16, 320>}, {transform_indices = @transform_4, window_bounds = array<i64: 1, 8, 320>}, {transform_indices = @transform_5, window_bounds = array<i64: 1, 8, 320>}]} {
    %c0 = arith.constant 0 : index
    %c0_0 = arith.constant 0 : index
    %0 = vector.load %arg2[%c0, %c0_0] : memref<16x36xf32, #tpu.memory_space<vmem>>, vector<16x36xf32>
    %c0_1 = arith.constant 0 : index
    %c0_2 = arith.constant 0 : index
    %1 = vector.load %arg3[%c0_1, %c0_2] : memref<16x1xf32, #tpu.memory_space<vmem>>, vector<16x1xf32>
    %c0_3 = arith.constant 0 : index
    %c0_4 = arith.constant 0 : index
    %c0_5 = arith.constant 0 : index
    %2 = vector.load %arg1[%c0_3, %c0_4, %c0_5] : memref<1x4x512xf32, #tpu.memory_space<vmem>>, vector<1x4x320xf32>
    %3 = vector.shape_cast %2 : vector<1x4x320xf32> to vector<4x320xf32>
    %c0_6 = arith.constant 0 : index
    %c0_7 = arith.constant 0 : index
    %4 = vector.load %arg7[%c0_6, %c0_7] : memref<36x320xf32, #tpu.memory_space<vmem>>, vector<4x320xf32>
    tpu.vector_store %arg7[%c0_6, %c0_7], %3 {strides = array<i32>} : memref<36x320xf32, #tpu.memory_space<vmem>>, vector<4x320xf32>,
    %c0_8 = arith.constant 0 : index
    %c0_9 = arith.constant 0 : index
    %c2 = arith.constant 2 : index
    %5 = vector.load %arg1[%c0_8, %c0_9, %c2] : memref<1x4x512xf32, #tpu.memory_space<vmem>>, vector<1x4x320xf32>
    %6 = vector.shape_cast %5 : vector<1x4x320xf32> to vector<4x320xf32>
    %c4 = arith.constant 4 : index
    %c0_10 = arith.constant 0 : index
    %7 = vector.load %arg7[%c4, %c0_10] : memref<36x320xf32, #tpu.memory_space<vmem>>, vector<4x320xf32>
    tpu.vector_store %arg7[%c4, %c0_10], %6 {strides = array<i32>} : memref<36x320xf32, #tpu.memory_space<vmem>>, vector<4x320xf32>,
    %c0_11 = arith.constant 0 : index
    %c0_12 = arith.constant 0 : index
    %c4_13 = arith.constant 4 : index
    %8 = vector.load %arg1[%c0_11, %c0_12, %c4_13] : memref<1x4x512xf32, #tpu.memory_space<vmem>>, vector<1x4x320xf32>
    %9 = vector.shape_cast %8 : vector<1x4x320xf32> to vector<4x320xf32>
    %c8 = arith.constant 8 : index
    %c0_14 = arith.constant 0 : index
    %10 = vector.load %arg7[%c8, %c0_14] : memref<36x320xf32, #tpu.memory_space<vmem>>, vector<4x320xf32>
    tpu.vector_store %arg7[%c8, %c0_14], %9 {strides = array<i32>} : memref<36x320xf32, #tpu.memory_space<vmem>>, vector<4x320xf32>,
    %c0_15 = arith.constant 0 : index
    %c0_16 = arith.constant 0 : index
    %c40 = arith.constant 40 : index
    %11 = vector.load %arg1[%c0_15, %c0_16, %c40] : memref<1x4x512xf32, #tpu.memory_space<vmem>>, vector<1x4x320xf32>
    %12 = vector.shape_cast %11 : vector<1x4x320xf32> to vector<4x320xf32>
    %c12 = arith.constant 12 : index
    %c0_17 = arith.constant 0 : index
    %13 = vector.load %arg7[%c12, %c0_17] : memref<36x320xf32, #tpu.memory_space<vmem>>, vector<4x320xf32>
    tpu.vector_store %arg7[%c12, %c0_17], %12 {strides = array<i32>} : memref<36x320xf32, #tpu.memory_space<vmem>>, vector<4x320xf32>,
    %c0_18 = arith.constant 0 : index
    %c0_19 = arith.constant 0 : index
    %c42 = arith.constant 42 : index
    %14 = vector.load %arg1[%c0_18, %c0_19, %c42] : memref<1x4x512xf32, #tpu.memory_space<vmem>>, vector<1x4x320xf32>
    %15 = vector.shape_cast %14 : vector<1x4x320xf32> to vector<4x320xf32>
    %c16 = arith.constant 16 : index
    %c0_20 = arith.constant 0 : index
    %16 = vector.load %arg7[%c16, %c0_20] : memref<36x320xf32, #tpu.memory_space<vmem>>, vector<4x320xf32>
    tpu.vector_store %arg7[%c16, %c0_20], %15 {strides = array<i32>} : memref<36x320xf32, #tpu.memory_space<vmem>>, vector<4x320xf32>,
    %c0_21 = arith.constant 0 : index
    %c0_22 = arith.constant 0 : index
    %c44 = arith.constant 44 : index
    %17 = vector.load %arg1[%c0_21, %c0_22, %c44] : memref<1x4x512xf32, #tpu.memory_space<vmem>>, vector<1x4x320xf32>
    %18 = vector.shape_cast %17 : vector<1x4x320xf32> to vector<4x320xf32>
    %c20 = arith.constant 20 : index
    %c0_23 = arith.constant 0 : index
    %19 = vector.load %arg7[%c20, %c0_23] : memref<36x320xf32, #tpu.memory_space<vmem>>, vector<4x320xf32>
    tpu.vector_store %arg7[%c20, %c0_23], %18 {strides = array<i32>} : memref<36x320xf32, #tpu.memory_space<vmem>>, vector<4x320xf32>,
    %c0_24 = arith.constant 0 : index
    %c0_25 = arith.constant 0 : index
    %c80 = arith.constant 80 : index
    %20 = vector.load %arg1[%c0_24, %c0_25, %c80] : memref<1x4x512xf32, #tpu.memory_space<vmem>>, vector<1x4x320xf32>
    %21 = vector.shape_cast %20 : vector<1x4x320xf32> to vector<4x320xf32>
    %c24 = arith.constant 24 : index
    %c0_26 = arith.constant 0 : index
    %22 = vector.load %arg7[%c24, %c0_26] : memref<36x320xf32, #tpu.memory_space<vmem>>, vector<4x320xf32>
    tpu.vector_store %arg7[%c24, %c0_26], %21 {strides = array<i32>} : memref<36x320xf32, #tpu.memory_space<vmem>>, vector<4x320xf32>,
    %c0_27 = arith.constant 0 : index
    %c0_28 = arith.constant 0 : index
    %c82 = arith.constant 82 : index
    %23 = vector.load %arg1[%c0_27, %c0_28, %c82] : memref<1x4x512xf32, #tpu.memory_space<vmem>>, vector<1x4x320xf32>
    %24 = vector.shape_cast %23 : vector<1x4x320xf32> to vector<4x320xf32>
    %c28 = arith.constant 28 : index
    %c0_29 = arith.constant 0 : index
    %25 = vector.load %arg7[%c28, %c0_29] : memref<36x320xf32, #tpu.memory_space<vmem>>, vector<4x320xf32>
    tpu.vector_store %arg7[%c28, %c0_29], %24 {strides = array<i32>} : memref<36x320xf32, #tpu.memory_space<vmem>>, vector<4x320xf32>,
    %c0_30 = arith.constant 0 : index
    %c0_31 = arith.constant 0 : index
    %c84 = arith.constant 84 : index
    %26 = vector.load %arg1[%c0_30, %c0_31, %c84] : memref<1x4x512xf32, #tpu.memory_space<vmem>>, vector<1x4x320xf32>
    %27 = vector.shape_cast %26 : vector<1x4x320xf32> to vector<4x320xf32>
    %c32 = arith.constant 32 : index
    %c0_32 = arith.constant 0 : index
    %28 = vector.load %arg7[%c32, %c0_32] : memref<36x320xf32, #tpu.memory_space<vmem>>, vector<4x320xf32>
    tpu.vector_store %arg7[%c32, %c0_32], %27 {strides = array<i32>} : memref<36x320xf32, #tpu.memory_space<vmem>>, vector<4x320xf32>,
    %c0_33 = arith.constant 0 : index
    %c0_34 = arith.constant 0 : index
    %29 = vector.load %arg7[%c0_33, %c0_34] : memref<36x320xf32, #tpu.memory_space<vmem>>, vector<36x320xf32>
    %cst = arith.constant dense<0.000000e+00> : vector<16x320xf32>
    %30 = tpu.matmul %0, %29, %cst {dimension_numbers = #tpu.dot_dimension_numbers<[1], [0], [0], [1], [0, 0, 1, 1], [], []>} : vector<16x36xf32>, vector<36x320xf32>, vector<16x320xf32> -> vector<16x320xf32>
    %31 = vector.broadcast %1 : vector<16x1xf32> to vector<16x320xf32>
    %32 = arith.addf %30, %31 : vector<16x320xf32>
    %cst_35 = arith.constant 0.000000e+00 : f32
    %33 = vector.broadcast %cst_35 : f32 to vector<16x320xf32>
    %34 = arith.maximumf %32, %33 : vector<16x320xf32>
    %c0_36 = arith.constant 0 : index
    %c0_37 = arith.constant 0 : index
    %c0_38 = arith.constant 0 : index
    %35 = vector.load %arg4[%c0_36, %c0_37, %c0_38] : memref<1x16x320xf32, #tpu.memory_space<vmem>>, vector<1x16x320xf32>
    %36 = vector.shape_cast %35 : vector<1x16x320xf32> to vector<16x320xf32>
    %37 = vector.shape_cast %34 : vector<16x320xf32> to vector<1x16x320xf32>
    tpu.vector_store %arg4[%c0_36, %c0_37, %c0_38], %37 {strides = array<i32>} : memref<1x16x320xf32, #tpu.memory_space<vmem>>, vector<1x16x320xf32>,
    %38 = vector.extract_strided_slice %34 {offsets = [0, 0], sizes = [8, 320], strides = [1, 1]} : vector<16x320xf32> to vector<8x320xf32>
    %c0_39 = arith.constant 0 : index
    %c0_40 = arith.constant 0 : index
    %c0_41 = arith.constant 0 : index
    %39 = vector.load %arg5[%c0_39, %c0_40, %c0_41] : memref<1x8x320xf32, #tpu.memory_space<vmem>>, vector<1x8x320xf32>
    %40 = vector.shape_cast %39 : vector<1x8x320xf32> to vector<8x320xf32>
    %41 = vector.shape_cast %38 : vector<8x320xf32> to vector<1x8x320xf32>
    tpu.vector_store %arg5[%c0_39, %c0_40, %c0_41], %41 {strides = array<i32>} : memref<1x8x320xf32, #tpu.memory_space<vmem>>, vector<1x8x320xf32>,
    %42 = vector.extract_strided_slice %34 {offsets = [8, 0], sizes = [8, 320], strides = [1, 1]} : vector<16x320xf32> to vector<8x320xf32>
    %c0_42 = arith.constant 0 : index
    %c0_43 = arith.constant 0 : index
    %c0_44 = arith.constant 0 : index
    %43 = vector.load %arg6[%c0_42, %c0_43, %c0_44] : memref<1x8x320xf32, #tpu.memory_space<vmem>>, vector<1x8x320xf32>
    %44 = vector.shape_cast %43 : vector<1x8x320xf32> to vector<8x320xf32>
    %45 = vector.shape_cast %42 : vector<8x320xf32> to vector<1x8x320xf32>
    tpu.vector_store %arg6[%c0_42, %c0_43, %c0_44], %45 {strides = array<i32>} : memref<1x8x320xf32, #tpu.memory_space<vmem>>, vector<1x8x320xf32>,
    return
  }
  func.func @transform_0(%arg0: i32) -> (i32, i32, i32) {
    %c0_i32 = arith.constant 0 : i32
    %c0_i32_0 = arith.constant 0 : i32
    %c0_i32_1 = arith.constant 0 : i32
    return %arg0, %c0_i32, %c0_i32_0 : i32, i32, i32
  }
  func.func @transform_1(%arg0: i32) -> (i32, i32) {
    %c0_i32 = arith.constant 0 : i32
    %c0_i32_0 = arith.constant 0 : i32
    %c0_i32_1 = arith.constant 0 : i32
    return %c0_i32, %c0_i32_0 : i32, i32
  }
  func.func @transform_2(%arg0: i32) -> (i32, i32) {
    %c0_i32 = arith.constant 0 : i32
    %c0_i32_0 = arith.constant 0 : i32
    %c0_i32_1 = arith.constant 0 : i32
    return %c0_i32, %c0_i32_0 : i32, i32
  }
  func.func @transform_3(%arg0: i32) -> (i32, i32, i32) {
    %c0_i32 = arith.constant 0 : i32
    %c0_i32_0 = arith.constant 0 : i32
    %c0_i32_1 = arith.constant 0 : i32
    return %arg0, %c0_i32, %c0_i32_0 : i32, i32, i32
  }
  func.func @transform_4(%arg0: i32) -> (i32, i32, i32) {
    %c0_i32 = arith.constant 0 : i32
    %c0_i32_0 = arith.constant 0 : i32
    %c0_i32_1 = arith.constant 0 : i32
    return %arg0, %c0_i32, %c0_i32_0 : i32, i32, i32
  }
  func.func @transform_5(%arg0: i32) -> (i32, i32, i32) {
    %c0_i32 = arith.constant 0 : i32
    %c0_i32_0 = arith.constant 0 : i32
    %c0_i32_1 = arith.constant 0 : i32
    return %arg0, %c0_i32, %c0_i32_0 : i32, i32, i32
  }
}

</mosaic_0001>

<bundles_post_ra>
// kernel: tpu_custom_call.1
= control target key start
LH: loop header
LB: loop body
LE: loop exit
PB: predicated region body
PF: predicated region fallthrough
CT: control target
= control target key end

     0   :  { %s1501_s0 = inlined_call_operand.hbm [shape: f32[2,4,512], index: 0, kind: input, shape index: {}]   ;;  %s1502_s1 = inlined_call_operand.vmem [shape: f32[16,36], index: 1, kind: input, shape index: {}]   ;;  %s1503_s2 = inlined_call_operand.vmem [shape: f32[16,1], index: 2, kind: input, shape index: {}]   ;;  %s1504_s3 = inlined_call_operand.hbm [shape: f32[2,16,320], index: 3, kind: output, shape index: {0}]   ;;  %s1505_s4 = inlined_call_operand.hbm [shape: f32[2,8,320], index: 4, kind: output, shape index: {1}]   ;;  %s1506_s5 = inlined_call_operand.hbm [shape: f32[2,8,320], index: 5, kind: output, shape index: {2}]  }
   0x1   :  { %1509 = sst [smem:[#allocation13_spill]] %s1501_s0 }
   0x2   :  { %1510 = sst [smem:[#allocation14_spill]] %s1502_s1 }
   0x3   :  { %11 = vsyncpa [#allocation4], 0 }
   0x4   :  { %13 = vsyncpa [#allocation4 + $0x1], 0 }
   0x5   :  { %14 = vsyncpa [#allocation5], 0 }
   0x6   :  { %16 = vsyncpa [#allocation5 + $0x1], 0 }
   0x7   :  { %17 = vsyncpa [#allocation8], 0 }
   0x8   :  { %19 = vsyncpa [#allocation8 + $0x1], 0  ;;  %s1190_s18 = smov 0   ;;  %s1192_s19 = smov 0  }
   0x9   :  { %s1194_s20 = smov 0   ;;  %s1196_s21 = smov 0  }
   0xa LB: > { %s1211_s22 = sadd.s32 4294967295, %s1142_s21   ;;  %s1508_s23 = sadd.s32 4294967294, %s1142_s21   ;;  %s1142_s21 = sphi %s1196_s21, %s1528_s21   ;;  %s1138_s20 = sphi %s1194_s20, %s1527_s20   ;;  %s1134_s19 = sphi %s1192_s19, %s1526_s19   ;;  %s1130_s18 = sphi %s1190_s18, %s1525_s18  }
   0xb   : > { %s1215_s24 = sadd.s32 1, %s1142_s21   ;;  %s32_s25 = sadd.s32 1, %s1138_s20 }
   0xc   : > { %s29_s26 = ssub.s32 %s1142_s21, %s1215_s24  ;;  %p39_p0 = scmp.ne.s32.totalorder %s1138_s20, %s1134_s19 }
   0xd   : > { %p30_p1 = scmp.eq.s32.totalorder %s29_s26, 0  ;;  %p40_p2 = scmp.eq.s32.totalorder %s1142_s21, 0 }
   0xe   : > { %p45_p3 = scmp.ne.s32.totalorder %s1134_s19, %s1130_s18  ;;  %p46_p4 = scmp.eq.s32.totalorder %s1211_s22, 0 }
   0xf   : > { %s1227_s27 = scalar_select %p30_p1, %s1138_s20, %s32_s25  }
  0x10   : > { %p1229_p5 = por %p40_p2, %p39_p0  ;;  %p1233_p6 = por %p46_p4, %p45_p3 }
  0x11   : > { %p111_p7 = scmp.eq.s32.totalorder %s1211_s22, 1  ;;  %p117_p8 = scmp.eq.s32.totalorder %s1508_s23, 1 }
  0x12   : > { %p931_p10 = scmp.lt.s32.totalorder %s1142_s21, 2  ;;  %s195_s7 = sand.u32 1, %s1138_s20  }
  0x13   : > { %p1242_p11 = por %p111_p7, %p39_p0  ;;  %p1246_p12 = por %p117_p8, %p45_p3 }
  0x14   : > { %s867_s8 = sshll.u32 %s1142_s21, 8  ;;  %s850_s9 = sshll.u32 %s195_s7, 4 }
  0x15   : > { %s1513_s30 = scalar_select %p1242_p11, 1, 0 }
  0x16   : > { %s1514_s6 = scalar_select %p1246_p12, 1, 0 }
  0x17   : > { %s1515_s0 = sld [smem:[#allocation13_spill]]  ;;  %s199_s13 = scalar_lea.vmem [#allocation3], %s850_s9 }
  0x18   : > { %s207_s14 = sshll.u32 %s199_s13, 4  ;;  %p1259_p13 = pnand %p931_p10, %p1229_p5  ;;  %s1263_s14 = int_to_ptr.vmem [resolvable:$true] %s207_s14 }
  0x19   : > { %s196_s16 = scalar_lea.sflag [#allocation4], %s195_s7 }
  0x1a   : > { %p988_p3 = pneg %p1259_p13 }
  0x1d   : > { %s1255_s12 = scalar_lea.hbm %s1515_s0, %s867_s8  ;;  %s991_s28 = scalar_lea.hbm %s1515_s0, 512 }
  0x1e   : > { %s986_s17 = scalar_lea.hbm %s1255_s12, 256  ;;  %p992_p5 = scmp.lt.u32.totalorder %s1255_s12, %s1515_s0 }
  0x1f   : > { %p987_p2 = scmp.ne.s32.totalorder %s1255_s12, %s986_s17  ;;  %p993_p8 = scmp.lt.u32.totalorder %s991_s28, %s986_s17 }
  0x20   : > { %p995_p9 = scmp.lt.u32.totalorder %s986_s17, %s1255_s12 }
  0x21   : > { %p989_p4 = pnand %p988_p3, %p987_p2  ;;  %p994_p10 = por %p993_p8, %p992_p5 }
  0x23   : > { %p990_p7 = pneg %p989_p4  ;;  %p996_p0 = por %p995_p9, %p994_p10 }
  0x25   : > { %p997_p1 = pnand %p996_p0, %p990_p7 }
  0x27   : > { %1000 = shalt.err (!%p997_p1)
}
  0x28   : > { %s1001_s7 = scalar_lea.vmem %s1263_s14, 256  ;;  %s1144_s10 = smov [#allocation3]  }
  0x29   : > { %p1002_p2 = scmp.ne.s32.totalorder %s1263_s14, %s1001_s7  ;;  %s1006_s11 = sshll.u32 %s1144_s10, 4  ;;  %s1007_s11 = int_to_ptr.vmem [resolvable:$false] %s1006_s11 }
  0x2a   : > { %s1008_s13 = scalar_lea.vmem %s1007_s11, 512  ;;  %p1009_p11 = scmp.lt.s32.totalorder %s1263_s14, %s1007_s11 }
  0x2b   : > { %p1004_p4 = pnand %p1002_p2, %p988_p3  ;;  %p1010_p5 = scmp.lt.s32.totalorder %s1008_s13, %s1001_s7 }
  0x2d   : > { %p1005_p12 = pneg %p1004_p4  ;;  %p1011_p8 = por %p1010_p5, %p1009_p11 }
  0x2f   : > { %p1012_p9 = pnand %p1011_p8, %p1005_p12 }
  0x31   : > { %1015 = shalt.err (!%p1012_p9)
}
  0x32   : > { %920 = dma.hbm_to_vmem [thread:$0]  (!%p1259_p13), %s1255_s12, 256, %s1263_s14, %s196_s16  }
  0x33   : > { %p1517_p0 = scmp.lt.s32.totalorder %s1142_s21, 3  ;;  %p1518_p1 = scmp.ge.s32.totalorder %s1142_s21, 1 }
  0x35   : > { %p213_p3 = pnand %p1518_p1, %p1517_p0 }
  0x36   : > { %s1297_s17 = sand.u32 (!%p213_p3), 1, %s1134_s19  }
  0x37   : > { %216 = sbr.rel (%p213_p3) target bundleno = 527 (0x20f), region = 32  ;;  %s854_s25 = sshll.u32 (!%p213_p3), %s1297_s17, 4 }
  0x38   : > { %s219_s26 = scalar_lea.sflag (!%p213_p3), [#allocation4], %s1297_s17  ;;  %s1301_s28 = scalar_lea.vmem (!%p213_p3), [#allocation3], %s854_s25 }
  0x3e   : > { %1117 = dma.done.wait (%p1233_p6), %s219_s26, 256  }
  0x3f   : > { %1119 = vsyncadd (%p1233_p6), %s219_s26, 4294967040  ;;  %v295_v0 = vld [vmem:[%s1301_s28 + $0x8] sm:$0xf]  ;;  %v272_v1 = vld [vmem:[%s1301_s28] sm:$0xff]  ;;  %s1145_s12 = smov 124   ;;  %s1146_s14 = smov 126  }
  0x40   : > { %303 = vrot.lane.b32.xlu1 %v295_v0, %s1145_s12  ;;  %280 = vrot.lane.b32.xlu0 %v272_v1, %s1146_s14  ;;  %v298_v2 = vcombine.high %v272_v1, %v272_v1  ;;  %268 = vst [vmem:[#allocation2] sm:$0xf] %v272_v1  ;;  %vm270_vm0 = vcmask 519168   ;;  %v264_v3 = vld [vmem:[%s1301_s28 + $0x8] sm:$0xf]  ;;  %s1147_s29 = smov 88   ;;  %v276_v6 = vcombine.low %v272_v1, %v272_v1 }
  0x41   : > { %271 = vst.msk [vmem:[#allocation2 + $0x10] sm:$0xf] %vm270_vm0, %v264_v3  ;;  %v981_v4 = vld [vmem:[%s1301_s28 + $0x8] ss:$0 sps:$4 sm:$0xff]   ;;  %s1148_s15 = smov 86   ;;  %s1149_s16 = smov 84  }
  0x42   : > { %269 = vst [vmem:[#allocation2 + $0x8] sm:$0xf] %v298_v2  ;;  %v982_v5 = vld [vmem:[%s1301_s28 + $0x8] ss:$0 sps:$4 sm:$0xff]   ;;  %s1150_s8 = smov 48   ;;  %s1151_s9 = smov 46  }
  0x43   : > { %v336_v7 = vld [vmem:[%s1301_s28 + $0x8] sm:$0xf]  ;;  %s1152_s7 = smov 44   ;;  %v1153_v12 = vmov 0.0   ;;  %s1519_s1 = sld [smem:[#allocation14_spill]]  ;;  %vm473_vm1 = vcmask 293888  }
  0x44   : > { %301 = vrot.lane.b32.xlu1 %v298_v2, %s1145_s12  ;;  %322 = vrot.lane.b32.xlu0 %v272_v1, %s1147_s29  ;;  %v983_v8 = vld [vmem:[%s1301_s28 + $0x8] ss:$0 sps:$4 sm:$0xff]   ;;  %v1154_v15 = vmov 0   ;;  %v262_v16 = vld [vmem:[%s1503_s2 + $0x8] sm:$0xff]  ;;  %vm305_vm2 = vcmask 1014784   ;;  %vm292_vm3 = vcmask 523268  }
  0x45   : > { %v377_v9 = vld [vmem:[%s1301_s28 + $0x8] sm:$0xff]  ;;  %554 = vmatprep.mubr.f32.mxu0 %v1153_v12  ;;  %977 = vset.pattern.permute.xlu1 %v1154_v15  ;;  %vm326_vm4 = vcmask 719872   ;;  %vm284_vm5 = vcmask 1031168   ;;  %vm346_vm6 = vcmask 703488   ;;  %vm367_vm7 = vcmask 687104   ;;  %s906_s13 = smul.u32 768, %s1211_s22 }
  0x46   : > { %v405_v10 = vcombine.low %v377_v9, %v377_v9  ;;  %v381_v11 = vcombine.high %v377_v9, %v377_v9  ;;  %v261_v14 = vld [vmem:[%s1503_s2] sm:$0xff]  ;;  %978 = vset.pattern.permute.xlu0 %v1154_v15  ;;  %vm390_vm8 = vcmask 392192   ;;  %vm414_vm9 = vcmask 375808   ;;  %s1520_s0 = sand.u32 1, %s1211_s22   ;;  %p1521_p11 = scmp.ne.s32.totalorder %s1513_s30, 0 }
  0x47   : > { %vm438_vm10 = vcmask 359424   ;;  %vm480_vm11 = vcmask 1043456   ;;  %vm650_vm12 = vcmask 523264   ;;  %s1393_s28 = scalar_lea.hbm %s1504_s3, %s906_s13 }
  0x48   : > { %324 = vrot.lane.b32.xlu1 %v981_v4, %s1147_s29  ;;  %282 = vrot.lane.b32.xlu0 %v982_v5, %s1146_s14 }
  0x49   : > { %v1320_v13 = vld [vmem:[%s1519_s1] sm:$0xff] }
  0x4a   : > { %885 = vmatprep.mubr.msk.f32.mxu1 %vm473_vm1, %v1320_v13 }
  0x4c   : > { %299 = vrot.lane.b32.xlu1 %v272_v1, %s1145_s12  ;;  %278 = vrot.lane.b32.xlu0 %v276_v6, %s1146_s14 }
  0x50   : > { %342 = vrot.lane.b32.xlu1 %v298_v2, %s1148_s15  ;;  %320 = vrot.lane.b32.xlu0 %v276_v6, %s1147_s29  ;;  %s904_s29 = smul.u32 48, %s1297_s17 }
  0x54   : > { %363 = vrot.lane.b32.xlu1 %v272_v1, %s1149_s16  ;;  %344 = vrot.lane.b32.xlu0 %v336_v7, %s1148_s15 }
  0x58   : > { %384 = vrot.lane.b32.xlu1 %v298_v2, %s1150_s8  ;;  %365 = vrot.lane.b32.xlu0 %v983_v8, %s1149_s16 }
  0x5c   : > { %408 = vrot.lane.b32.xlu1 %v272_v1, %s1151_s9  ;;  %386 = vrot.lane.b32.xlu0 %v377_v9, %s1150_s8 }
  0x60   : > { %340 = vrot.lane.b32.xlu1 %v272_v1, %s1148_s15  ;;  %410 = vrot.lane.b32.xlu0 %v405_v10, %s1151_s9  ;;  %s905_s15 = smul.u32 24, %s1297_s17 }
  0x62   : > { %s1367_s10 = scalar_lea.vmem [#allocation7], %s905_s15  ;;  %s258_s25 = scalar_lea.vmem [#allocation9], %s905_s15 }
  0x63   : > { %s702_s11 = sshll.u32 %s1367_s10, 4  ;;  %s716_s26 = sshll.u32 %s258_s25, 4  ;;  %s1384_s11 = int_to_ptr.vmem [resolvable:$true] %s702_s11  ;;  %s1395_s26 = int_to_ptr.vmem [resolvable:$true] %s716_s26 }
  0x64   : > { %382 = vrot.lane.b32.xlu1 %v272_v1, %s1150_s8  ;;  %361 = vrot.lane.b32.xlu0 %v276_v6, %s1149_s16  ;;  %s1362_s16 = scalar_lea.vmem [#allocation6], %s904_s29  ;;  %s1016_s13 = scalar_lea.vmem %s1384_s11, 384 }
  0x65   : > { %p1017_p6 = scmp.ne.s32.totalorder %s1384_s11, %s1016_s13  ;;  %s1155_s29 = smov [#allocation7]  }
  0x67   : > { %p1018_p12 = pnand %p1017_p6, %p1521_p11 }
  0x68   : > { %388 = vrot.lane.b32.xlu1 %v381_v11, %s1150_s8  ;;  %406 = vrot.lane.b32.xlu0 %v276_v6, %s1151_s9  ;;  %s685_s8 = sshll.u32 %s1362_s16, 4  ;;  %s1370_s8 = int_to_ptr.vmem [resolvable:$true] %s685_s8 }
  0x69   : > { %p1019_p13 = pneg %p1018_p12 }
  0x6c   : > { %432 = vrot.lane.b32.xlu1 %v298_v2, %s1152_s7  ;;  %412 = vrot.lane.b32.xlu0 %v377_v9, %s1151_s9 }
  0x70   : > { %430 = vrot.lane.b32.xlu1 %v272_v1, %s1152_s7  ;;  %434 = vrot.lane.b32.xlu0 %v377_v9, %s1152_s7 }
  0x74   : > { %436 = vrot.lane.b32.xlu0 %v381_v11, %s1152_s7  ;;  %465 = vperm.xlu1 %977, %v261_v14   ;;  %s907_s7 = smul.u32 384, %s1211_s22 }
  0x76   : > { %s1382_s14 = scalar_lea.hbm %s1505_s4, %s907_s7  ;;  %s1407_s9 = scalar_lea.hbm %s1506_s5, %s907_s7 }
  0x78   : > { %470 = vperm.xlu0 %978, %v262_v16  }
  0xb2   : > { %v304_v17 = vpop.permute.xlu1 %303  ;;  %v281_v18 = vpop.permute.xlu0 %280 }
  0xb3   : > { %313 = vst.msk [vmem:[#allocation2 + $0x28] sm:$0xf] %vm270_vm0, %v304_v17 }
  0xb6   : > { %v302_v19 = vpop.permute.xlu1 %301  ;;  %v323_v20 = vpop.permute.xlu0 %322 }
  0xb7   : > { %v307_v21 = vsel %vm305_vm2, %v302_v19, %v304_v17 }
  0xb8   : > { %312 = vst [vmem:[#allocation2 + $0x20] sm:$0xf] %v307_v21 }
  0xba   : > { %v325_v22 = vpop.permute.xlu1 %324  ;;  %v283_v23 = vpop.permute.xlu0 %282 }
  0xbb   : > { %v328_v24 = vsel %vm326_vm4, %v323_v20, %v325_v22  ;;  %334 = vst.msk [vmem:[#allocation2 + $0x28] sm:$0xf0] %vm292_vm3, %v325_v22  ;;  %v286_v25 = vsel %vm284_vm5, %v281_v18, %v283_v23  ;;  %293 = vst.msk [vmem:[#allocation2 + $0x10] sm:$0xf0] %vm292_vm3, %v283_v23  ;;  %v260_v22 = vld [vmem:[%s1519_s1 + $0x8] sm:$0xff]  ;;  %s1411_s1 = scalar_lea.sflag [#allocation8], %s1520_s0 }
  0xbc   : > { %333 = vst [vmem:[#allocation2 + $0x20] sm:$0xf0] %v328_v24  ;;  %291 = vst [vmem:[#allocation2 + $0x8] sm:$0xf0] %v286_v25 }
  0xbe   : > { %v300_v26 = vpop.permute.xlu1 %299  ;;  %v279_v27 = vpop.permute.xlu0 %278 }
  0xbf   : > { %v306_v28 = vsel %vm305_vm2, %v300_v26, %v302_v19  ;;  %v285_v29 = vsel %vm284_vm5, %v279_v27, %v281_v18 }
  0xc0   : > { %311 = vst [vmem:[#allocation2 + $0x18] sm:$0xf] %v306_v28  ;;  %290 = vst [vmem:[#allocation2] sm:$0xf0] %v285_v29 }
  0xc2   : > { %v343_v30 = vpop.permute.xlu1 %342  ;;  %v321_v31 = vpop.permute.xlu0 %320  ;;  %v450_v32 = vld [vmem:[#allocation2 + $0x10] sm:$0xff]  ;;  %v453_v33 = vld [vmem:[#allocation2 + $0x28] sm:$0xff] }
  0xc3   : > { %v327_v34 = vsel %vm326_vm4, %v321_v31, %v323_v20  ;;  %v896_v35 = vpack.c.bf16 %v453_v33, %v450_v32  ;;  %v449_v36 = vld [vmem:[#allocation2 + $0x8] sm:$0xff]  ;;  %v452_v37 = vld [vmem:[#allocation2 + $0x20] sm:$0xff] }
  0xc4   : > { %332 = vst [vmem:[#allocation2 + $0x18] sm:$0xf0] %v327_v34  ;;  %v888_v38 = vpack.c.bf16 %v452_v37, %v449_v36 }
  0xc5   : > { %897 = vmatprep.subr.bf16.mxu1 %v896_v35 }
  0xc6   : > { %v364_v39 = vpop.permute.xlu1 %363  ;;  %v345_v40 = vpop.permute.xlu0 %344  ;;  %889 = vmatprep.subr.bf16.mxu0 %v888_v38  ;;  %899 = vmatpush3.bf16.msra.mxu1 %v896_v35 }
  0xc7   : > { %v348_v41 = vsel %vm346_vm6, %v343_v30, %v345_v40  ;;  %354 = vst.msk [vmem:[#allocation2 + $0x40] sm:$0xf] %vm270_vm0, %v345_v40  ;;  %v448_v45 = vld [vmem:[#allocation2] sm:$0xff] }
  0xc8   : > { %353 = vst [vmem:[#allocation2 + $0x38] sm:$0xf] %v348_v41 }
  0xca   : > { %v385_v42 = vpop.permute.xlu1 %384  ;;  %v366_v43 = vpop.permute.xlu0 %365 }
  0xcb   : > { %v369_v44 = vsel %vm367_vm7, %v364_v39, %v366_v43  ;;  %375 = vst.msk [vmem:[#allocation2 + $0x40] sm:$0xf0] %vm292_vm3, %v366_v43  ;;  %v451_v46 = vld [vmem:[#allocation2 + $0x18] sm:$0xff] }
  0xcc   : > { %374 = vst [vmem:[#allocation2 + $0x38] sm:$0xf0] %v369_v44  ;;  %v890_v47 = vpack.c.bf16 %v451_v46, %v448_v45 }
  0xce   : > { %v409_v48 = vpop.permute.xlu1 %408  ;;  %v387_v49 = vpop.permute.xlu0 %386  ;;  %891 = vmatpush1.bf16.msra.mxu0 %v890_v47 }
  0xcf   : > { %v392_v50 = vsel %vm390_vm8, %v385_v42, %v387_v49 }
  0xd0   : > { %398 = vst [vmem:[#allocation2 + $0x50] sm:$0xf] %v392_v50 }
  0xd2   : > { %v341_v51 = vpop.permute.xlu1 %340  ;;  %v411_v52 = vpop.permute.xlu0 %410  ;;  %v456_v16 = vld [vmem:[#allocation2 + $0x40] sm:$0xff] }
  0xd3   : > { %v347_v53 = vsel %vm346_vm6, %v341_v51, %v343_v30  ;;  %v416_v54 = vsel %vm414_vm9, %v409_v48, %v411_v52  ;;  %v455_v63 = vld [vmem:[#allocation2 + $0x38] sm:$0xff] }
  0xd4   : > { %352 = vst [vmem:[#allocation2 + $0x30] sm:$0xf] %v347_v53  ;;  %422 = vst [vmem:[#allocation2 + $0x50] sm:$0xf0] %v416_v54 }
  0xd6   : > { %v383_v55 = vpop.permute.xlu1 %382  ;;  %v362_v56 = vpop.permute.xlu0 %361 }
  0xd7   : > { %v391_v57 = vsel %vm390_vm8, %v383_v55, %v385_v42  ;;  %v368_v58 = vsel %vm367_vm7, %v362_v56, %v364_v39 }
  0xd8   : > { %397 = vst [vmem:[#allocation2 + $0x48] sm:$0xf] %v391_v57  ;;  %373 = vst [vmem:[#allocation2 + $0x30] sm:$0xf0] %v368_v58 }
  0xda   : > { %v389_v59 = vpop.permute.xlu1 %388  ;;  %v407_v60 = vpop.permute.xlu0 %406 }
  0xdb   : > { %v393_v61 = vsel %vm390_vm8, %v387_v49, %v389_v59  ;;  %v415_v62 = vsel %vm414_vm9, %v407_v60, %v409_v48  ;;  %v458_v0 = vld [vmem:[#allocation2 + $0x50] sm:$0xff] }
  0xdc   : > { %399 = vst.msk [vmem:[#allocation2 + $0x58] sm:$0xf] %vm270_vm0, %v393_v61  ;;  %421 = vst [vmem:[#allocation2 + $0x48] sm:$0xf0] %v415_v62  ;;  %v892_v1 = vpack.c.bf16 %v458_v0, %v455_v63 }
  0xde   : > { %v433_v2 = vpop.permute.xlu1 %432  ;;  %v413_v3 = vpop.permute.xlu0 %412  ;;  %893 = vmatprep.subr.bf16.mxu0 %v892_v1 }
  0xdf   : > { %v417_v4 = vsel %vm414_vm9, %v411_v52, %v413_v3  ;;  %v454_v9 = vld [vmem:[#allocation2 + $0x30] sm:$0xff] }
  0xe0   : > { %423 = vst.msk [vmem:[#allocation2 + $0x58] sm:$0xf0] %vm292_vm3, %v417_v4 }
  0xe2   : > { %v431_v5 = vpop.permute.xlu1 %430  ;;  %v435_v6 = vpop.permute.xlu0 %434 }
  0xe3   : > { %v439_v7 = vsel %vm438_vm10, %v431_v5, %v433_v2  ;;  %v440_v8 = vsel %vm438_vm10, %v433_v2, %v435_v6  ;;  %v457_v10 = vld [vmem:[#allocation2 + $0x48] sm:$0xff] }
  0xe4   : > { %445 = vst [vmem:[#allocation2 + $0x60] sm:$0xf] %v439_v7  ;;  %446 = vst [vmem:[#allocation2 + $0x68] sm:$0xf] %v440_v8  ;;  %v894_v11 = vpack.c.bf16 %v457_v10, %v454_v9 }
  0xe6   : > { %v437_v14 = vpop.permute.xlu0 %436  ;;  %895 = vmatpush1.bf16.msra.mxu0 %v894_v11 }
  0xe7   : > { %v441_v15 = vsel %vm438_vm10, %v435_v6, %v437_v14  ;;  %v459_v17 = vld [vmem:[#allocation2 + $0x58] sm:$0xff] }
  0xe8   : > { %447 = vst.msk [vmem:[#allocation2 + $0x70] sm:$0xf] %vm270_vm0, %v441_v15  ;;  %v900_v18 = vpack.c.bf16 %v459_v17, %v456_v16 }
  0xea   : > { %901 = vmatprep.subr.bf16.mxu1 %v900_v18 }
  0xeb   : > { %903 = vmatpush3.bf16.msra.mxu1 %v900_v18  ;;  %v461_v19 = vld [vmem:[#allocation2 + $0x68] sm:$0xf]  ;;  %v460_v20 = vld [vmem:[#allocation2 + $0x60] sm:$0xf] }
  0xec   : > { %855 = vmatprep.subr.msk.mxu0 %vm480_vm11, %v461_v19 }
  0xed   : > { %856 = vmatpush1.msk.msra.mxu0 %vm480_vm11, %v460_v20 }
  0xee   : > { %857 = vmatmul.mubr.msk.f32.vlgmr.msra.gmra.mrb[0].mxu0 %vm473_vm1, %v1320_v13 }
  0xef   : > { %v462_v21 = vld [vmem:[#allocation2 + $0x70] sm:$0xf]  ;;  %560 = vmatprep.mubr.f32.mxu0 %v1153_v12 }
  0xf0   : > { %883 = vmatprep.subr.msk.mxu1 %vm480_vm11, %v462_v21 }
  0xf1   : > { %884 = vmatpush3.msk.msra.mxu1 %vm480_vm11, %v462_v21 }
  0xf2   : > { %858 = vmatmul.mubr.msk.f32.gmra.mrb[2].mxu0 %vm473_vm1, %v260_v22  ;;  %886 = vmatmul.mubr.msk.f32.vlgmr.msra.gmra.mrb[0].mxu1 %vm473_vm1, %v260_v22 }
  0xf3   : > { %v466_v23 = vpop.permute.xlu1 %465 }
  0xf7   : > { %v471_v26 = vpop.permute.xlu0 %470 }
 0x1c1   : > { %v556_v24 = vpop.f32.mrb[0].mxu0 }
 0x1c2   : > { %v557_v13 = vadd.f32 %v556_v24, %v466_v23  ;;  %v558_v25 = vpop.f32.mrb[1].mxu0 }
 0x1c3   : > { %v559_v12 = vadd.f32 %v558_v25, %v466_v23 }
 0x1c4   : > { %v642_v27 = vmax.f32 %v557_v13, 0.0 }
 0x1c5   : > { %v643_v28 = vmax.f32 %v559_v12, 0.0  ;;  %v562_v29 = vpop.f32.mrb[2].mxu0  ;;  %v887_v30 = vpop.f32.mrb[0].mxu1 }
 0x1c6   : > { %648 = vst [vmem:[%s1362_s16] sm:$0xff] %v642_v27  ;;  %655 = vst [vmem:[%s1367_s10] sm:$0xff] %v642_v27  ;;  %v563_v31 = vadd.f32 %v562_v29, %v471_v26  ;;  %v639_v32 = vadd.f32 %v887_v30, %v471_v26  ;;  %v564_v33 = vpop.f32.mrb[3].mxu0  ;;  %v633_v34 = vpop.f32.mrb[1].mxu1 }
 0x1c7   : > { %649 = vst [vmem:[%s1362_s16 + $0x8] sm:$0xff] %v643_v28  ;;  %656 = vst [vmem:[%s1367_s10 + $0x8] sm:$0xff] %v643_v28  ;;  %v565_v35 = vadd.f32 %v564_v33, %v471_v26  ;;  %v634_v36 = vadd.f32 %v633_v34, %v466_v23 }
 0x1c8   : > { %v645_v37 = vmax.f32 %v563_v31, 0.0  ;;  %v647_v38 = vmax.f32 %v639_v32, 0.0 }
 0x1c9   : > { %v646_v39 = vmax.f32 %v565_v35, 0.0  ;;  %v644_v40 = vmax.f32 %v634_v36, 0.0 }
 0x1ca   : > { %652 = vst [vmem:[%s1362_s16 + $0x18] sm:$0xff] %v645_v37  ;;  %658 = vst [vmem:[%s258_s25] sm:$0xff] %v645_v37 }
 0x1cb   : > { %654 = vst.msk [vmem:[%s1362_s16 + $0x28] sm:$0xff] %vm650_vm12, %v647_v38  ;;  %660 = vst.msk [vmem:[%s258_s25 + $0x10] sm:$0xff] %vm650_vm12, %v647_v38 }
 0x1cc   : > { %653 = vst [vmem:[%s1362_s16 + $0x20] sm:$0xff] %v646_v39  ;;  %659 = vst [vmem:[%s258_s25 + $0x8] sm:$0xff] %v646_v39  ;;  %s1020_s25 = sshll.u32 %s1155_s29, 4  ;;  %s1021_s25 = int_to_ptr.vmem [resolvable:$false] %s1020_s25 }
 0x1cd   : > { %651 = vst.msk [vmem:[%s1362_s16 + $0x10] sm:$0xff] %vm650_vm12, %v644_v40  ;;  %657 = vst.msk [vmem:[%s1367_s10 + $0x10] sm:$0xff] %vm650_vm12, %v644_v40  ;;  %s1022_s16 = scalar_lea.vmem %s1021_s25, 768  ;;  %p1023_p7 = scmp.lt.s32.totalorder %s1384_s11, %s1021_s25 }
 0x1ce   : > { %p1024_p10 = scmp.lt.s32.totalorder %s1022_s16, %s1016_s13 }
 0x1d0   : > { %p1025_p2 = por %p1024_p10, %p1023_p7 }
 0x1d2   : > { %p1026_p4 = pnand %p1025_p2, %p1019_p13 }
 0x1d4   : > { %1029 = shalt.err (!%p1026_p4)
}
 0x1d5   : > { %s1030_s0 = scalar_lea.hbm %s1382_s14, 384  ;;  %s1034_s7 = scalar_lea.hbm %s1505_s4, 768 }
 0x1d6   : > { %p1031_p5 = scmp.ne.s32.totalorder %s1382_s14, %s1030_s0  ;;  %p1035_p0 = scmp.lt.u32.totalorder %s1382_s14, %s1505_s4 }
 0x1d7   : > { %p1036_p1 = scmp.lt.u32.totalorder %s1034_s7, %s1030_s0  ;;  %p1038_p6 = scmp.lt.u32.totalorder %s1030_s0, %s1382_s14 }
 0x1d8   : > { %p1032_p8 = pnand %p1031_p5, %p1521_p11 }
 0x1d9   : > { %p1037_p3 = por %p1036_p1, %p1035_p0 }
 0x1da   : > { %p1033_p9 = pneg %p1032_p8 }
 0x1db   : > { %p1039_p12 = por %p1038_p6, %p1037_p3 }
 0x1dd   : > { %p1040_p13 = pnand %p1039_p12, %p1033_p9 }
 0x1df   : > { %1043 = shalt.err (!%p1040_p13)
}
 0x1e0   : > { %912 = dma.vmem_to_hbm [thread:$0]  (%p1521_p11), %s1384_s11, 384, %s1382_s14, %s1411_s1  }
 0x1e1   : > { %s662_s12 = scalar_lea.sflag [#allocation5], %s1297_s17  ;;  %s1044_s13 = scalar_lea.vmem %s1370_s8, 768 }
 0x1e2   : > { %p1045_p7 = scmp.ne.s32.totalorder %s1370_s8, %s1044_s13  ;;  %s1156_s29 = smov [#allocation6]  }
 0x1e3   : > { %s1048_s25 = sshll.u32 %s1156_s29, 4  ;;  %s1049_s25 = int_to_ptr.vmem [resolvable:$false] %s1048_s25 }
 0x1e4   : > { %p1046_p10 = pnand %p1045_p7, %p1521_p11  ;;  %s1050_s16 = scalar_lea.vmem %s1049_s25, 1536 }
 0x1e5   : > { %p1051_p4 = scmp.lt.s32.totalorder %s1370_s8, %s1049_s25  ;;  %p1052_p5 = scmp.lt.s32.totalorder %s1050_s16, %s1044_s13 }
 0x1e6   : > { %p1047_p2 = pneg %p1046_p10 }
 0x1e7   : > { %p1053_p8 = por %p1052_p5, %p1051_p4 }
 0x1e9   : > { %p1054_p9 = pnand %p1053_p8, %p1047_p2 }
 0x1eb   : > { %1057 = shalt.err (!%p1054_p9)
}
 0x1ec   : > { %s1058_s11 = scalar_lea.hbm %s1393_s28, 768  ;;  %s1062_s22 = scalar_lea.hbm %s1504_s3, 1536 }
 0x1ed   : > { %p1059_p0 = scmp.ne.s32.totalorder %s1393_s28, %s1058_s11  ;;  %p1063_p6 = scmp.lt.u32.totalorder %s1393_s28, %s1504_s3 }
 0x1ee   : > { %p1064_p12 = scmp.lt.u32.totalorder %s1062_s22, %s1058_s11  ;;  %p1066_p7 = scmp.lt.u32.totalorder %s1058_s11, %s1393_s28 }
 0x1ef   : > { %p1060_p1 = pnand %p1059_p0, %p1521_p11 }
 0x1f0   : > { %p1065_p13 = por %p1064_p12, %p1063_p6 }
 0x1f1   : > { %p1061_p3 = pneg %p1060_p1 }
 0x1f2   : > { %p1067_p10 = por %p1066_p7, %p1065_p13 }
 0x1f4   : > { %p1068_p2 = pnand %p1067_p10, %p1061_p3 }
 0x1f6   : > { %1071 = shalt.err (!%p1068_p2)
}
 0x1f7   : > { %s1157_s10 = smov 384   ;;  %s1158_s15 = smov 24  }
 0x1f8   : > { %911 = dma.vmem_to_hbm [thread:$0]  (%p1521_p11), %s1370_s8, 768, %s1393_s28, %s662_s12, %s1157_s10, %s1157_s10, %s1158_s15  }
 0x1f9   : > { %s1072_s13 = scalar_lea.vmem %s1395_s26, 384  ;;  %s1159_s29 = smov [#allocation9]  }
 0x1fa   : > { %p1073_p4 = scmp.ne.s32.totalorder %s1395_s26, %s1072_s13  ;;  %s1076_s25 = sshll.u32 %s1159_s29, 4  ;;  %s1077_s25 = int_to_ptr.vmem [resolvable:$false] %s1076_s25 }
 0x1fb   : > { %s1078_s16 = scalar_lea.vmem %s1077_s25, 768  ;;  %p1079_p9 = scmp.lt.s32.totalorder %s1395_s26, %s1077_s25 }
 0x1fc   : > { %p1074_p5 = pnand %p1073_p4, %p1521_p11  ;;  %p1080_p0 = scmp.lt.s32.totalorder %s1078_s16, %s1072_s13 }
 0x1fe   : > { %p1075_p8 = pneg %p1074_p5  ;;  %p1081_p1 = por %p1080_p0, %p1079_p9 }
 0x200   : > { %p1082_p3 = pnand %p1081_p1, %p1075_p8 }
 0x202   : > { %1085 = shalt.err (!%p1082_p3)
}
 0x203   : > { %s1086_s17 = scalar_lea.hbm %s1407_s9, 384  ;;  %s1090_s12 = scalar_lea.hbm %s1506_s5, 768 }
 0x204   : > { %p1087_p6 = scmp.ne.s32.totalorder %s1407_s9, %s1086_s17  ;;  %p1091_p7 = scmp.lt.u32.totalorder %s1407_s9, %s1506_s5 }
 0x205   : > { %p1092_p10 = scmp.lt.u32.totalorder %s1090_s12, %s1086_s17  ;;  %p1094_p4 = scmp.lt.u32.totalorder %s1086_s17, %s1407_s9 }
 0x206   : > { %p1088_p12 = pnand %p1087_p6, %p1521_p11 }
 0x207   : > { %p1093_p2 = por %p1092_p10, %p1091_p7 }
 0x208   : > { %p1089_p13 = pneg %p1088_p12 }
 0x209   : > { %p1095_p5 = por %p1094_p4, %p1093_p2 }
 0x20b   : > { %p1096_p8 = pnand %p1095_p5, %p1089_p13 }
 0x20d   : > { %1099 = shalt.err (!%p1096_p8)
}
 0x20e   : > { %913 = dma.vmem_to_hbm [thread:$0]  (%p1521_p11), %s1395_s26, 384, %s1407_s9, %s1411_s1  }
 0x20f PF: > { %s728_s0 = sand.u32 1, %s1130_s18   ;;  %p1522_p9 = scmp.ne.s32.totalorder %s1514_s6, 0 }
 0x210   : > { %p1523_p0 = scmp.ge.s32.totalorder %s1142_s21, 2  ;;  %s729_s22 = scalar_lea.sflag [#allocation5], %s728_s0 }
 0x212   : > { %p922_p1 = pnand %p1523_p0, %p1522_p9 }
 0x214   : > { %1121 = dma.done.wait (!%p922_p1), %s729_s22, 768  }
 0x215   : > { %1123 = vsyncadd (!%p922_p1), %s729_s22, 4294966528  ;;  %s1524_s23 = sadd.s32 4294967294, %s1142_s21  }
 0x216   : > { %s737_s7 = sand.u32 1, %s1524_s23  }
 0x217   : > { %s738_s10 = scalar_lea.sflag [#allocation8], %s737_s7 }
 0x218   : > { %1125 = dma.done.wait (!%p922_p1), %s738_s10, 768  }
 0x219   : > { %1127 = vsyncadd (!%p922_p1), %s738_s10, 4294966528  ;;  %p22_p11 = scmp.ge.s32.totalorder %s1215_s24, 4   ;;  %s1525_s18 = smov %s1134_s19 }
 0x21a   : > { %s1526_s19 = smov %s1138_s20  ;;  %s1527_s20 = smov %s1227_s27 }
 0x21b   : > { %s1528_s21 = smov %s1215_s24  ;;  %24 = sbr.rel (!%p22_p11) target bundleno = 10 (0xa), region = 109 }
 0x222   :  { %752 = vsyncpa [#allocation4], 1 }
 0x223   :  { %754 = vsyncpa [#allocation4 + $0x1], 1 }
 0x224   :  { %755 = vsyncpa [#allocation5], 1 }
 0x225   :  { %757 = vsyncpa [#allocation5 + $0x1], 1 }
 0x226   :  { %758 = vsyncpa [#allocation8], 1 }
 0x227   :  { %760 = vsyncpa [#allocation8 + $0x1], 1 }

</bundles_post_ra>
